<compile_context>
chip_gen: v5e
topology: v5e:2x2
jax: 0.10.0
libtpu: 0.0.40
codegen_flags: <defaults>
</compile_context>

<pallas_src>
import jax
import jax.numpy as jnp
from jax.experimental import pallas as pl
from jax.experimental.pallas import tpu as pltpu


MIN_VALUE = 0.0
MAX_VALUE = 1.0

_BLOCK_ELEMS = 1 << 20      # ~1M elems per block -> 4 MiB for f32
_SMALL_ELEMS = 64 * 1024    # below ~256 KiB (f32): single full-extent block
_MIN_GRID = 4               # >= 2 blocks per TensorCore on v7x megacore


def _mul_clamp_kernel(x1_ref, x2_ref, o_ref):
    v = x1_ref[...] * x2_ref[...]
    # max-then-min matches torch.clamp_min / clamp_max (and NaN propagation).
    o_ref[...] = jnp.minimum(jnp.maximum(v, MIN_VALUE), MAX_VALUE)


def _mul_clamp_2d(x1_flat, x2_flat, cols):
    """Run the streaming kernel over a zero-copy (rows, cols) view."""
    total = x1_flat.size
    rows = total // cols
    x1_s = x1_flat.reshape(rows, cols)
    x2_s = x2_flat.reshape(rows, cols)

    if total <= _SMALL_ELEMS or rows < 8 * _MIN_GRID:
        # Tiny input: single full-extent block (exempt from (8,128) rule).
        block_rows = rows
        grid_rows = 1
    else:
        # Target ~4 MiB per input block, but keep at least _MIN_GRID blocks so
        # both v7x TensorCores get work and DMA overlaps the VPU.
        block_rows = min(_BLOCK_ELEMS // cols, rows // _MIN_GRID)
        block_rows = max(8, (block_rows // 8) * 8)   # sublane-aligned
        grid_rows = pl.cdiv(rows, block_rows)        # partial last block OK

    out_s = pl.pallas_call(
        _mul_clamp_kernel,
        out_shape=jax.ShapeDtypeStruct((rows, cols), x1_flat.dtype),
        grid=(grid_rows,),
        in_specs=[
            pl.BlockSpec((block_rows, cols), lambda i: (i, 0)),
            pl.BlockSpec((block_rows, cols), lambda i: (i, 0)),
        ],
        out_specs=pl.BlockSpec((block_rows, cols), lambda i: (i, 0)),
        compiler_params=pltpu.CompilerParams(
            dimension_semantics=("parallel",),       # megacore sharding on v7x
            vmem_limit_bytes=48 * 1024 * 1024,       # 16 MiB headroom on v7x
        ),
    )(x1_s, x2_s)
    return out_s.reshape(-1)


def mul_clamp(x1, x2):
    assert x1.shape == x2.shape and x1.dtype == x2.dtype
    orig_shape = x1.shape
    total = x1.size
    if total == 0:
        return jnp.clip(x1 * x2, MIN_VALUE, MAX_VALUE)

    x1_flat = x1.reshape(-1)
    x2_flat = x2.reshape(-1)

    # Widest lane-dense column count that divides the element count so the
    # 1D -> 2D reshape is a zero-copy bitcast (no jnp.pad, no output slice).
    cols = None
    for c in (1024, 512, 256, 128):
        if total % c == 0:
            cols = c
            break

    if cols is not None:
        out_flat = _mul_clamp_2d(x1_flat, x2_flat, cols)
        return out_flat.reshape(orig_shape)

    # Rare ragged case: kernel on the lane-aligned prefix, fused jnp.clip on
    # the (<128-element) tail.  Avoids padding whole-array HBM passes.
    aligned = (total // 128) * 128
    tail_out = jnp.clip(x1_flat[aligned:] * x2_flat[aligned:],
                        MIN_VALUE, MAX_VALUE)
    if aligned == 0:
        return tail_out.reshape(orig_shape)
    head_out = _mul_clamp_2d(x1_flat[:aligned], x2_flat[:aligned], 128)
    return jnp.concatenate([head_out, tail_out]).reshape(orig_shape)


if __name__ == "__main__":
    key = jax.random.PRNGKey(0)
    k1, k2, k3, k4, k5, k6 = jax.random.split(key, 6)

    # Primary small test consistent with the module's 4D NCHW input.
    x1 = jax.random.normal(k1, (2, 4, 16, 16), dtype=jnp.float32)
    x2 = jax.random.normal(k2, (2, 4, 16, 16), dtype=jnp.float32)
    out = mul_clamp(x1, x2)
    jax.block_until_ready(out)
    ref = jnp.clip(x1 * x2, MIN_VALUE, MAX_VALUE)
    assert out.shape == x1.shape
    assert jnp.allclose(out, ref, atol=1e-6), "mismatch vs reference (small)"

    # Multi-block tiled path: total = 256000 = 250 * 1024 (zero-copy reshape,
    # partial last block exercised).
    y1 = jax.random.normal(k3, (4, 4, 128, 125), dtype=jnp.float32)
    y2 = jax.random.normal(k4, (4, 4, 128, 125), dtype=jnp.float32)
    out2 = mul_clamp(y1, y2)
    jax.block_until_ready(out2)
    ref2 = jnp.clip(y1 * y2, MIN_VALUE, MAX_VALUE)
    assert out2.shape == y1.shape
    assert jnp.allclose(out2, ref2, atol=1e-6), "mismatch vs reference (tiled)"

    # Ragged path: 231 elements (not a multiple of 128) -> prefix kernel + tail.
    z1 = jax.random.normal(k5, (1, 3, 7, 11), dtype=jnp.float32)
    z2 = jax.random.normal(k6, (1, 3, 7, 11), dtype=jnp.float32)
    out3 = mul_clamp(z1, z2)
    jax.block_until_ready(out3)
    ref3 = jnp.clip(z1 * z2, MIN_VALUE, MAX_VALUE)
    assert out3.shape == z1.shape
    assert jnp.allclose(out3, ref3, atol=1e-6), "mismatch vs reference (ragged)"

    print("KERNEL_OK")
</pallas_src>

<mosaic_0001>
module attributes {stable_mosaic.version = 11 : i64} {
  func.func @_mul_clamp_kernel(%arg0: i32, %arg1: memref<2x1024xf32, #tpu.memory_space<vmem>>, %arg2: memref<2x1024xf32, #tpu.memory_space<vmem>>, %arg3: memref<2x1024xf32, #tpu.memory_space<vmem>>) attributes {dimension_semantics = [#tpu.dimension_semantics<parallel>], iteration_bounds = array<i64: 1>, scalar_prefetch = 0 : i64, scratch_operands = 0 : i64, tpu.core_type = #tpu.core_type<tc>, window_params = [{transform_indices = @transform_0, window_bounds = array<i64: 2, 1024>}, {transform_indices = @transform_1, window_bounds = array<i64: 2, 1024>}, {transform_indices = @transform_2, window_bounds = array<i64: 2, 1024>}]} {
    %c0 = arith.constant 0 : index
    %c0_0 = arith.constant 0 : index
    %0 = vector.load %arg1[%c0, %c0_0] : memref<2x1024xf32, #tpu.memory_space<vmem>>, vector<2x1024xf32>
    %c0_1 = arith.constant 0 : index
    %c0_2 = arith.constant 0 : index
    %1 = vector.load %arg2[%c0_1, %c0_2] : memref<2x1024xf32, #tpu.memory_space<vmem>>, vector<2x1024xf32>
    %2 = arith.mulf %0, %1 : vector<2x1024xf32>
    %cst = arith.constant 0.000000e+00 : f32
    %3 = vector.broadcast %cst : f32 to vector<2x1024xf32>
    %4 = arith.maximumf %2, %3 : vector<2x1024xf32>
    %cst_3 = arith.constant 1.000000e+00 : f32
    %5 = vector.broadcast %cst_3 : f32 to vector<2x1024xf32>
    %6 = arith.minimumf %4, %5 : vector<2x1024xf32>
    %c0_4 = arith.constant 0 : index
    %c0_5 = arith.constant 0 : index
    %7 = vector.load %arg3[%c0_4, %c0_5] : memref<2x1024xf32, #tpu.memory_space<vmem>>, vector<2x1024xf32>
    tpu.vector_store %arg3[%c0_4, %c0_5], %6 {strides = array<i32>} : memref<2x1024xf32, #tpu.memory_space<vmem>>, vector<2x1024xf32>,
    return
  }
  func.func @transform_0(%arg0: i32) -> (i32, i32) {
    %c0_i32 = arith.constant 0 : i32
    %c0_i32_0 = arith.constant 0 : i32
    return %arg0, %c0_i32 : i32, i32
  }
  func.func @transform_1(%arg0: i32) -> (i32, i32) {
    %c0_i32 = arith.constant 0 : i32
    %c0_i32_0 = arith.constant 0 : i32
    return %arg0, %c0_i32 : i32, i32
  }
  func.func @transform_2(%arg0: i32) -> (i32, i32) {
    %c0_i32 = arith.constant 0 : i32
    %c0_i32_0 = arith.constant 0 : i32
    return %arg0, %c0_i32 : i32, i32
  }
}

</mosaic_0001>

<bundles_post_ra>
// kernel: tpu_custom_call.1
= control target key start
LH: loop header
LB: loop body
LE: loop exit
PB: predicated region body
PF: predicated region fallthrough
CT: control target
= control target key end

     0   :  { %7 = vsyncpa [#allocation3], 0  ;;  %s178_s0 = inlined_call_operand.hbm [shape: f32[2,1024], index: 0, kind: input, shape index: {}]   ;;  %s179_s1 = inlined_call_operand.hbm [shape: f32[2,1024], index: 1, kind: input, shape index: {}]   ;;  %s180_s2 = inlined_call_operand.hbm [shape: f32[2,1024], index: 2, kind: output, shape index: {}]  }
   0x1   :  { %8 = vsyncpa [#allocation6], 0 }
   0x2   :  { %9 = vsyncpa [#allocation4], 0  ;;  %s15_s11 = sshll.u32 %s178_s0, 4  ;;  %s151_s12 = smov [#allocation2]   ;;  %s16_s11 = int_to_ptr.hbm [resolvable:$true] %s15_s11 }
   0x3   :  { %s17_s13 = sshll.u32 %s151_s12, 4  ;;  %s26_s16 = sshll.u32 %s179_s1, 4  ;;  %s18_s13 = int_to_ptr.vmem [resolvable:$true] %s17_s13  ;;  %s27_s16 = int_to_ptr.hbm [resolvable:$true] %s26_s16 }
   0x4   :  { %20 = dma.hbm_to_vmem [thread:$0]  %s16_s11, 256, %s18_s13, [#allocation3]  }
   0x5   :  { %s152_s17 = smov [#allocation5]  }
   0x6   :  { %s28_s18 = sshll.u32 %s152_s17, 4  ;;  %s29_s18 = int_to_ptr.vmem [resolvable:$true] %s28_s18 }
   0x7   :  { %31 = dma.hbm_to_vmem [thread:$0]  %s27_s16, 256, %s29_s18, [#allocation6]  }
   0x8   :  { %145 = dma.done.wait [#allocation3], 256  }
   0x9   :  { %146 = vsyncadd [#allocation3], 4294967040 }
   0xa   :  { %147 = dma.done.wait [#allocation6], 256  }
   0xb   :  { %148 = vsyncadd [#allocation6], 4294967040  ;;  %v40_v0 = vld [vmem:[#allocation2] sm:$0xff]  ;;  %v42_v1 = vld [vmem:[#allocation5] sm:$0xff]  ;;  %s153_s0 = smov [#allocation7]   ;;  %s59_s21 = sshll.u32 %s180_s2, 4  ;;  %s60_s21 = int_to_ptr.hbm [resolvable:$true] %s59_s21 }
   0xc   :  { %v41_v2 = vld [vmem:[#allocation2 + $0x8] sm:$0xff]  ;;  %v44_v3 = vmul.f32 %v42_v1, %v40_v0  ;;  %v43_v4 = vld [vmem:[#allocation5 + $0x8] sm:$0xff]  ;;  %s57_s19 = sshll.u32 %s153_s0, 4  ;;  %s58_s19 = int_to_ptr.vmem [resolvable:$true] %s57_s19 }
   0xd   :  { %v45_v5 = vmul.f32 %v43_v4, %v41_v2 }
   0xe   :  { %v46_v6 = vmax.f32 %v44_v3, 0.0 }
   0xf   :  { %v47_v7 = vmax.f32 %v45_v5, 0.0 }
  0x10   :  { %v48_v8 = vmin.f32 %v46_v6, 1.0 }
  0x11   :  { %v49_v9 = vmin.f32 %v47_v7, 1.0 }
  0x12   :  { %50 = vst [vmem:[#allocation7] sm:$0xff] %v48_v8 }
  0x13   :  { %51 = vst [vmem:[#allocation7 + $0x8] sm:$0xff] %v49_v9 }
  0x14   :  { %62 = dma.vmem_to_hbm [thread:$0]  %s58_s19, 256, %s60_s21, [#allocation4]  }
  0x15   :  { %149 = dma.done.wait [#allocation4], 256  }
  0x16   :  { %150 = vsyncadd [#allocation4], 4294967040 }
  0x17   :  { %67 = vsyncpa [#allocation3], 1 }
  0x18   :  { %68 = vsyncpa [#allocation6], 1 }
  0x19   :  { %69 = vsyncpa [#allocation4], 1 }

</bundles_post_ra>
